<compile_context>
chip_gen: v6e
topology: v6e:2x2x1
jax: 0.10.0
libtpu: 0.0.40
codegen_flags: <defaults>
</compile_context>

<pallas_src>
import functools

import jax
import jax.numpy as jnp
from jax.experimental import pallas as pl
from jax.experimental.pallas import tpu as pltpu

LANE = 128        # TPU vreg lane width
SUBLANE = 8       # TPU vreg sublane count
_ALIGN = SUBLANE * LANE   # 1024 elements: minimal pad unit (one sublane-aligned row group)


def _multispike_kernel(x_ref, o_ref, *, min_value, max_value, inv_norm, compute_dtype):
    # x_ref / o_ref: (row_block, LANE) lane-dense tiles (last block may be partial).
    x = x_ref[...].astype(compute_dtype)
    # torch semantics: round(clamp(x, min, max)) / Norm. torch.round == round-half-even,
    # same as jnp.round; division is folded to a reciprocal multiply at trace time.
    y = jnp.round(jnp.clip(x, min_value, max_value)) * inv_norm
    o_ref[...] = y.astype(o_ref.dtype)


def multispike(x, min_value=0.0, max_value=4.0, norm=None, *, block_bytes=2 * 1024 * 1024):
    """MultiSpike forward (inference). Elementwise and layout-agnostic: the input is viewed
    as a lane-dense (rows, 128) slab and streamed through ~2 MiB row blocks."""
    if norm is None:
        norm = max_value
    orig_shape = x.shape
    dtype = x.dtype
    if not jnp.issubdtype(dtype, jnp.floating):
        raise TypeError(f"multispike expects a floating dtype, got {dtype}")

    n = x.size
    itemsize = jnp.dtype(dtype).itemsize

    # Minimal padding: only up to a multiple of 1024 elements so the flat tensor reshapes to
    # a sublane-aligned (rows, 128) slab. Aligned sizes (very common) pay zero extra traffic.
    flat = x.reshape(-1)
    padded_n = pl.cdiv(n, _ALIGN) * _ALIGN
    padded = padded_n != n
    if padded:
        flat = jnp.pad(flat, (0, padded_n - n))
    rows = padded_n // LANE
    x2 = flat.reshape(rows, LANE)

    # Row-block sizing:
    #  * ~block_bytes per block (default 2 MiB -> 4096 rows f32 / 8192 rows bf16) so per-step
    #    DMA dominates the fixed ~0.35 us grid-step overhead on all generations;
    #  * double-buffered in + out footprint = 4 * block_bytes = 8 MiB -> fits default scoped
    #    VMEM everywhere (v5e 16 MiB, v6e/v7x 32 MiB) without vmem_limit_bytes tweaks;
    #  * if the tensor is big, cap the block so the grid has >= 4 tiles, letting the
    #    "parallel" axis shard work across both v7x TensorCores.
    row_block = max(SUBLANE, (block_bytes // (LANE * itemsize) // SUBLANE) * SUBLANE)
    rb = min(row_block, rows)
    min_rows_for_split = 4 * 512   # quarters still >= ~256 KiB so the split stays cheap
    if rows >= min_rows_for_split:
        quarter = pl.cdiv(pl.cdiv(rows, 4), SUBLANE) * SUBLANE
        rb = min(rb, quarter)
    rb = max(SUBLANE, (rb // SUBLANE) * SUBLANE)

    grid = (pl.cdiv(rows, rb),)   # partial last block handled by Pallas (masked writeback)

    # Compute in the input dtype when it is f32/bf16 (0..4 and the quantized outputs for
    # Norm=4 are exact in bf16); any other float goes through f32.
    compute_dtype = dtype if dtype in (jnp.float32, jnp.bfloat16) else jnp.float32

    kernel = functools.partial(
        _multispike_kernel,
        min_value=float(min_value),
        max_value=float(max_value),
        inv_norm=float(1.0 / norm),
        compute_dtype=compute_dtype,
    )

    out = pl.pallas_call(
        kernel,
        out_shape=jax.ShapeDtypeStruct((rows, LANE), dtype),
        grid_spec=pltpu.PrefetchScalarGridSpec(
            num_scalar_prefetch=0,
            grid=grid,
            in_specs=[pl.BlockSpec((rb, LANE), lambda i: (i, 0))],
            out_specs=pl.BlockSpec((rb, LANE), lambda i: (i, 0)),
        ),
        compiler_params=pltpu.CompilerParams(
            # Row tiles are independent -> shard across TensorCores on v7x; no-op on
            # v5e/v6e (single TC), so free to enable.
            dimension_semantics=("parallel",),
        ),
        cost_estimate=pl.CostEstimate(
            flops=3 * padded_n,                      # clamp + round + mul per element
            transcendentals=0,
            bytes_accessed=2 * padded_n * itemsize,  # pure HBM-streaming: read + write
        ),
    )(x2)

    if padded:
        return out.reshape(-1)[:n].reshape(orig_shape)
    return out.reshape(orig_shape)


def reference(x, min_value=0.0, max_value=4.0, norm=None):
    """Pure-JAX reference of MultiSpike.forward."""
    if norm is None:
        norm = max_value
    return jnp.round(jnp.clip(x, min_value, max_value)) / norm


if __name__ == "__main__":
    key = jax.random.PRNGKey(0)
    B, C, H, W = 2, 4, 16, 16
    # Scale so values span (and exceed) the [0, 4] clamp range.
    x = jax.random.normal(key, (B, C, H, W), jnp.float32) * 3.0

    y = jax.block_until_ready(multispike(x))
    y_ref = reference(x)
    assert y.shape == x.shape
    assert y.dtype == x.dtype
    assert float(jnp.max(jnp.abs(y - y_ref))) < 1e-6, "Pallas kernel mismatch (aligned f32)"

    # Misaligned element count -> exercises the minimal-pad + trailing-slice path.
    x_odd = jax.random.normal(jax.random.PRNGKey(1), (2, 4, 15, 17), jnp.float32) * 3.0
    y_odd = jax.block_until_ready(multispike(x_odd))
    assert y_odd.shape == x_odd.shape
    assert float(jnp.max(jnp.abs(y_odd - reference(x_odd)))) < 1e-6, "mismatch (misaligned f32)"

    # bf16 input -> compute stays in bf16 (exact for the 0..4 quant levels).
    x_bf = (jax.random.normal(jax.random.PRNGKey(2), (B, C, H, W), jnp.float32) * 3.0).astype(
        jnp.bfloat16)
    y_bf = jax.block_until_ready(multispike(x_bf))
    assert y_bf.dtype == jnp.bfloat16
    diff = jnp.abs(y_bf.astype(jnp.float32) - reference(x_bf).astype(jnp.float32))
    assert float(jnp.max(diff)) < 1e-6, "Pallas kernel mismatch (bf16)"

    print("KERNEL_OK")
</pallas_src>

<mosaic_0001>
module attributes {stable_mosaic.version = 11 : i64} {
  func.func @_multispike_kernel(%arg0: i32, %arg1: memref<16x128xf32, #tpu.memory_space<vmem>>, %arg2: memref<16x128xf32, #tpu.memory_space<vmem>>) attributes {dimension_semantics = [#tpu.dimension_semantics<parallel>], iteration_bounds = array<i64: 1>, scalar_prefetch = 0 : i64, scratch_operands = 0 : i64, tpu.core_type = #tpu.core_type<tc>, window_params = [{transform_indices = @transform_0, window_bounds = array<i64: 16, 128>}, {transform_indices = @transform_1, window_bounds = array<i64: 16, 128>}]} {
    %c0 = arith.constant 0 : index
    %c0_0 = arith.constant 0 : index
    %0 = vector.load %arg1[%c0, %c0_0] : memref<16x128xf32, #tpu.memory_space<vmem>>, vector<16x128xf32>
    %cst = arith.constant 0.000000e+00 : f32
    %cst_1 = arith.constant 4.000000e+00 : f32
    %1 = vector.broadcast %cst : f32 to vector<16x128xf32>
    %2 = arith.maximumf %1, %0 : vector<16x128xf32>
    %3 = vector.broadcast %cst_1 : f32 to vector<16x128xf32>
    %4 = arith.minimumf %3, %2 : vector<16x128xf32>
    %5 = math.roundeven %4 : vector<16x128xf32>
    %cst_2 = arith.constant 2.500000e-01 : f32
    %6 = vector.broadcast %cst_2 : f32 to vector<16x128xf32>
    %7 = arith.mulf %5, %6 : vector<16x128xf32>
    %c0_3 = arith.constant 0 : index
    %c0_4 = arith.constant 0 : index
    %8 = vector.load %arg2[%c0_3, %c0_4] : memref<16x128xf32, #tpu.memory_space<vmem>>, vector<16x128xf32>
    tpu.vector_store %arg2[%c0_3, %c0_4], %7 {strides = array<i32>} : memref<16x128xf32, #tpu.memory_space<vmem>>, vector<16x128xf32>,
    return
  }
  func.func @transform_0(%arg0: i32) -> (i32, i32) {
    %c0_i32 = arith.constant 0 : i32
    %c0_i32_0 = arith.constant 0 : i32
    return %arg0, %c0_i32 : i32, i32
  }
  func.func @transform_1(%arg0: i32) -> (i32, i32) {
    %c0_i32 = arith.constant 0 : i32
    %c0_i32_0 = arith.constant 0 : i32
    return %arg0, %c0_i32 : i32, i32
  }
}

</mosaic_0001>

<bundles_post_ra>
// kernel: tpu_custom_call.1
= control target key start
LH: loop header
LB: loop body
LE: loop exit
PB: predicated region body
PF: predicated region fallthrough
CT: control target
= control target key end

     0   :  { %6 = vsyncpa [#allocation3], 0  ;;  %s142_s0 = inlined_call_operand.hbm [shape: f32[16,128], index: 0, kind: input, shape index: {}]   ;;  %s143_s1 = inlined_call_operand.hbm [shape: f32[16,128], index: 1, kind: output, shape index: {}]  }
   0x1   :  { %7 = vsyncpa [#allocation4], 0  ;;  %s116_s6 = smov [#allocation2]  }
   0x2   :  { %s13_s7 = sshll.u32 %s116_s6, 4  ;;  %s14_s7 = int_to_ptr.vmem [resolvable:$true] %s13_s7 }
   0x3   :  { %s80_s8 = scalar_lea.vmem %s14_s7, 256  ;;  %p85_p1 = scmp.lt.s32.totalorder %s14_s7, %s14_s7 }
   0x4   :  { %p81_p0 = scmp.ne.s32.totalorder %s14_s7, %s80_s8  ;;  %p86_p2 = scmp.lt.s32.totalorder %s80_s8, %s80_s8 }
   0x6   :  { %p87_p3 = por %p86_p2, %p85_p1 }
   0x8   :  { %p88_p4 = pnand %p87_p3, %p81_p0 }
   0xa   :  { %91 = shalt.err (!%p88_p4)
}
   0xb   :  { %s117_s9 = smov 128   ;;  %s118_s10 = smov 8  }
   0xc   :  { %19 = dma.hbm_to_vmem [thread:$0]  %s142_s0, 256, %s14_s7, [#allocation3], %s117_s9, %s117_s9, %s118_s10  }
   0xd   :  { %112 = dma.done.wait [#allocation3], 256  }
   0xe   :  { %113 = vsyncadd [#allocation3], 4294967040  ;;  %v23_v0 = vld [vmem:[#allocation2] sm:$0xff]  ;;  %v24_v1 = vld [vmem:[#allocation2 + $0x8] sm:$0xff]  ;;  %s119_s0 = smov [#allocation5]  }
   0xf   :  { %v25_v2 = vmax.f32 %v23_v0, 0.0  ;;  %v26_v3 = vmax.f32 %v24_v1, 0.0  ;;  %s40_s13 = sshll.u32 %s119_s0, 4  ;;  %s41_s13 = int_to_ptr.vmem [resolvable:$true] %s40_s13 }
  0x10   :  { %s92_s14 = scalar_lea.vmem %s41_s13, 256  ;;  %p97_p6 = scmp.lt.s32.totalorder %s41_s13, %s41_s13 }
  0x11   :  { %v27_v4 = vmin.f32 %v25_v2, 4.0  ;;  %v28_v5 = vmin.f32 %v26_v3, 4.0  ;;  %p93_p5 = scmp.ne.s32.totalorder %s41_s13, %s92_s14  ;;  %p98_p7 = scmp.lt.s32.totalorder %s92_s14, %s92_s14 }
  0x13   :  { %v54_v6 = vcvt.f32.s32 %v27_v4  ;;  %v52_v7 = vand.u32 2147483647, %v27_v4  ;;  %v62_v8 = vcvt.f32.s32 %v28_v5  ;;  %v57_v10 = vand.u32 2147483648, %v27_v4  ;;  %p99_p8 = por %p98_p7, %p97_p6 }
  0x14   :  { %v60_v11 = vand.u32 2147483647, %v28_v5  ;;  %v65_v13 = vand.u32 2147483648, %v28_v5 }
  0x15   :  { %v55_v9 = vcvt.s32.f32 %v54_v6  ;;  %v63_v12 = vcvt.s32.f32 %v62_v8  ;;  %vm53_vm0 = vcmp.lt.f32.partialorder %v52_v7, 8388608.0  ;;  %p100_p9 = pnand %p99_p8, %p93_p5 }
  0x16   :  { %vm61_vm1 = vcmp.lt.f32.partialorder %v60_v11, 8388608.0 }
  0x17   :  { %v56_v14 = vand.u32 2147483647, %v55_v9  ;;  %v64_v15 = vand.u32 2147483647, %v63_v12 }
  0x19   :  { %v58_v16 = vor.u32 %v57_v10, %v56_v14  ;;  %v66_v17 = vor.u32 %v65_v13, %v64_v15 }
  0x1b   :  { %v59_v18 = vsel %vm53_vm0, %v58_v16, %v27_v4  ;;  %v67_v20 = vsel %vm61_vm1, %v66_v17, %v28_v5 }
  0x1c   :  { %v31_v19 = vmul.f32 0.25, %v59_v18  ;;  %v32_v21 = vmul.f32 0.25, %v67_v20 }
  0x1e   :  { %33 = vst [vmem:[#allocation5] sm:$0xff] %v31_v19  ;;  %34 = vst [vmem:[#allocation5 + $0x8] sm:$0xff] %v32_v21 }
  0x1f   :  { %103 = shalt.err (!%p100_p9)
}
  0x20   :  { %46 = dma.vmem_to_hbm [thread:$0]  %s41_s13, 256, %s143_s1, [#allocation4], %s117_s9, %s117_s9, %s118_s10  }
  0x21   :  { %114 = dma.done.wait [#allocation4], 256  }
  0x22   :  { %115 = vsyncadd [#allocation4], 4294967040 }
  0x23   :  { %50 = vsyncpa [#allocation3], 1 }
  0x24   :  { %51 = vsyncpa [#allocation4], 1 }

</bundles_post_ra>
